<compile_context>
chip_gen: v7x
topology: tpu7x:2x2x1
jax: 0.10.0
libtpu: 0.0.40
codegen_flags: <defaults>
</compile_context>

<pallas_src>
import functools

import jax
import jax.numpy as jnp
from jax.experimental import pallas as pl
from jax.experimental.pallas import tpu as pltpu

# ------------------------------ tiling helpers ------------------------------

_LANE = 128
_SUBLANE = 16                              # bf16-friendly row padding
_TARGET_W_BLOCK_BYTES = 2 * 1024 * 1024    # ~2 MB streamed bf16 weight block


def _round_up(x, m):
    return (x + m - 1) // m * m


def _k_tiling(k, n_lanes, itemsize=2):
    """Pick (tk, nk, kp): tk % 128 == 0, kp = nk*tk >= k, weight block ~2 MB."""
    kp128 = _round_up(max(int(k), 1), _LANE)
    tk_target = max(_LANE,
                    (_TARGET_W_BLOCK_BYTES // (n_lanes * itemsize)) // _LANE * _LANE)
    nk = max(1, -(-kp128 // tk_target))          # ceil
    tk = _round_up(-(-kp128 // nk), _LANE)       # balanced tile, multiple of 128
    return tk, nk, nk * tk


def _single_layer_tn(n_p):
    """N tile for single-layer calls (enables a parallel N axis for 2-TC v7x)."""
    for tn in (512, 384, 256, 128):
        if n_p % tn == 0:
            return tn
    return n_p


# ------------------------------ fused MLP kernel -----------------------------

def _act(y, kind):
    if kind == "leaky":
        return jnp.where(y > 0, y, 0.1 * y)        # LeakyReLU(0.1)
    if kind == "sigmoid":
        return 0.5 * (jnp.tanh(0.5 * y) + 1.0)     # overflow-safe sigmoid
    return y


def _fused_mlp_kernel(*refs, n_layers, acts):
    # refs = (x, w0, b0, w1, b1, ..., out)
    x_ref, o_ref = refs[0], refs[-1]
    k = pl.program_id(1)
    nk = pl.num_programs(1)

    @pl.when(k == 0)
    def _():
        o_ref[...] = jnp.zeros_like(o_ref)

    # layer-0 partial product, accumulated in the VMEM-resident f32 output block
    o_ref[...] += jnp.dot(x_ref[...], refs[1][...],
                          preferred_element_type=jnp.float32)

    @pl.when(k == nk - 1)
    def _():
        h = _act(o_ref[...] + refs[2][...], acts[0])
        for i in range(1, n_layers):
            w_ref, b_ref = refs[1 + 2 * i], refs[2 + 2 * i]
            h = jnp.dot(h.astype(jnp.bfloat16), w_ref[...],
                        preferred_element_type=jnp.float32) + b_ref[...]
            h = _act(h, acts[i])
        o_ref[...] = h.astype(o_ref.dtype)


def fused_mlp(x, layers, acts):
    """act_L(...act_0(x @ W0 + b0) @ W1 + b1 ...) as ONE pallas_call.

    x      : (M, K) f32, logical (un-padded) shape.
    layers : [(W_i, b_i)] with W_i bf16, already zero-padded (layer-0 rows to
             the K tiling, all columns to multiples of 128); b_i f32 (1, N_i).
    Returns the padded (M, N_last) f32 result (caller slices logical columns).
    """
    m, k = x.shape
    n_layers = len(layers)
    w0 = layers[0][0]
    kp_stored, n0p = w0.shape

    if n_layers > 1:
        # chained layers consume the full first-layer output -> no N tiling
        assert all(w.shape[1] == n0p for w, _ in layers), "padded widths must match"
        tn = n0p
    else:
        tn = _single_layer_tn(n0p)
    nn = n0p // tn

    tk, nk, kp = _k_tiling(k, tn)
    assert kp == kp_stored, (k, kp, kp_stored)

    # pad rows (sublane-friendly) + K (to the tile grid), cast activations bf16
    mp = _round_up(m, _SUBLANE)
    x = jnp.pad(x, ((0, mp - m), (0, kp - k))).astype(jnp.bfloat16)

    in_specs = [pl.BlockSpec((mp, tk), lambda i, j: (0, j)),
                pl.BlockSpec((tk, tn), lambda i, j: (j, i)),
                pl.BlockSpec((1, tn), lambda i, j: (0, i))]
    operands = [x, layers[0][0], layers[0][1]]
    for w, b in layers[1:]:
        in_specs += [pl.BlockSpec(w.shape, lambda i, j: (0, 0)),
                     pl.BlockSpec((1, w.shape[1]), lambda i, j: (0, 0))]
        operands += [w, b]

    n_last = layers[-1][0].shape[1]
    kernel = functools.partial(_fused_mlp_kernel,
                               n_layers=n_layers, acts=tuple(acts))
    out = pl.pallas_call(
        kernel,
        out_shape=jax.ShapeDtypeStruct((mp, n_last), jnp.float32),
        grid_spec=pltpu.PrefetchScalarGridSpec(
            num_scalar_prefetch=0,
            grid=(nn, nk),
            in_specs=in_specs,
            out_specs=pl.BlockSpec((mp, tn), lambda i, j: (0, i)),
        ),
        compiler_params=pltpu.CompilerParams(
            dimension_semantics=("parallel", "arbitrary"),
            vmem_limit_bytes=32 * 1024 * 1024,
        ),
    )(*operands)
    return out[:m]


# ------------------------------ parameter init ------------------------------
# PyTorch-style uniform(-1/sqrt(fan_in), +1/sqrt(fan_in)); weights are stored
# already transposed as (in, out), zero-padded, and cast to bf16.

def _uniform_linear(key, fan_in, fan_out):
    kw, kb = jax.random.split(key)
    bound = 1.0 / (fan_in ** 0.5)
    w = jax.random.uniform(kw, (fan_in, fan_out), jnp.float32, -bound, bound)
    b = jax.random.uniform(kb, (fan_out,), jnp.float32, -bound, bound)
    return w, b


def _pad_layer(w, b, rows_p, cols_p):
    kk, nn_ = w.shape
    wp = jnp.zeros((rows_p, cols_p), jnp.float32).at[:kk, :nn_].set(w)
    bp = jnp.zeros((1, cols_p), jnp.float32).at[0, :nn_].set(b)
    return wp.astype(jnp.bfloat16), bp


def init_params(key, atten_dim, hidden, q_dim, im_hw, im_cin, conv_out, ans_dim):
    hp = _round_up(hidden, _LANE)
    cout_p = _round_up(conv_out, _LANE)
    keys = jax.random.split(key, 12)

    def first_kp(k_logical, n_lanes):
        return _k_tiling(k_logical, n_lanes)[2]

    p = {}
    # atten_input: Linear(atten_dim,h) + 2x Linear(h,h), LeakyReLU(0.1) each
    w, b = _uniform_linear(keys[0], atten_dim, hidden)
    l0 = _pad_layer(w, b, first_kp(atten_dim, hp), hp)
    w, b = _uniform_linear(keys[1], hidden, hidden)
    l1 = _pad_layer(w, b, hp, hp)
    w, b = _uniform_linear(keys[2], hidden, hidden)
    p["att"] = [l0, l1, _pad_layer(w, b, hp, hp)]

    # im_feat_in: Conv2d(im_cin, conv_out, 1) == per-pixel Linear(im_cin, conv_out)
    w, b = _uniform_linear(keys[3], im_cin, conv_out)
    p["conv"] = [_pad_layer(w, b, first_kp(im_cin, _single_layer_tn(cout_p)), cout_p)]

    # im_feat_linear: Linear(H*W*conv_out, h) + Linear(h, h)
    im_flat = im_hw[0] * im_hw[1] * conv_out
    w, b = _uniform_linear(keys[4], im_flat, hidden)
    l0 = _pad_layer(w, b, first_kp(im_flat, hp), hp)
    w, b = _uniform_linear(keys[5], hidden, hidden)
    p["iml"] = [l0, _pad_layer(w, b, hp, hp)]

    # question_feat_in: Linear(q_dim, h) + Linear(h, h)
    w, b = _uniform_linear(keys[6], q_dim, hidden)
    l0 = _pad_layer(w, b, first_kp(q_dim, hp), hp)
    w, b = _uniform_linear(keys[7], hidden, hidden)
    p["q"] = [l0, _pad_layer(w, b, hp, hp)]

    # answer_score_in: Linear(ans_dim, h)
    w, b = _uniform_linear(keys[8], ans_dim, hidden)
    p["ans"] = [_pad_layer(w, b, first_kp(ans_dim, hp), hp)]

    # corr_pred_layer: Linear(4h, h), Linear(h, h//2), Linear(h//2, 1), Sigmoid
    # First weight's rows are scattered to match the 128-lane-padded concat.
    w, b = _uniform_linear(keys[9], 4 * hidden, hidden)
    w0p = jnp.zeros((4 * hp, hp), jnp.float32)
    for i in range(4):
        w0p = w0p.at[i * hp:i * hp + hidden, :hidden].set(
            w[i * hidden:(i + 1) * hidden])
    b0p = jnp.zeros((1, hp), jnp.float32).at[0, :hidden].set(b)
    head0 = (w0p.astype(jnp.bfloat16), b0p)
    w, b = _uniform_linear(keys[10], hidden, hidden // 2)
    head1 = _pad_layer(w, b, hp, hp)          # cols padded to hp (zeros beyond h//2)
    w, b = _uniform_linear(keys[11], hidden // 2, 1)
    head2 = _pad_layer(w, b, hp, hp)          # only column 0 is the real output
    p["head"] = [head0, head1, head2]

    cfg = {"hidden": hidden, "hp": hp, "conv_out": conv_out, "im_hw": tuple(im_hw)}
    return p, cfg


# ------------------------------ forward pass ---------------------------------
# Semantics of uncertainatt_net_cam_bigger.forward.
# TODO(synk): register_hook(save_gradients) / ques_cam hook are backward-only
# gradient capture hooks; they have no forward-pass effect and are not modeled.

def forward(params, cfg, attention, im_feat, q_feat, ans_scores):
    hidden, conv_out = cfg["hidden"], cfg["conv_out"]

    # --- attention branch: 3x (Linear + LeakyReLU(0.1)), fused in one call ---
    att_feats = fused_mlp(attention, params["att"], ("leaky", "leaky", "leaky"))

    # --- image branch: 1x1 conv (NCHW) == per-pixel matmul over channels ---
    # TODO(synk): the NCHW<->NHWC transposes stay in XLA; negligible next to the
    # dominant weight streaming, but could be folded into the kernel index_map.
    b, cin, h, w = im_feat.shape
    x = jnp.transpose(im_feat, (0, 2, 3, 1)).reshape(b * h * w, cin)
    y = fused_mlp(x, params["conv"], ("none",))[:, :conv_out]
    im_feats_feature = jnp.transpose(y.reshape(b, h, w, conv_out), (0, 3, 1, 2))

    # .view(B, -1) on contiguous NCHW -> channel-major flatten
    im_flat = im_feats_feature.reshape(b, -1)
    im_feats = fused_mlp(im_flat, params["iml"], ("leaky", "leaky"))

    # --- question branch ---
    q_feats = fused_mlp(q_feat, params["q"], ("leaky", "leaky"))

    # --- answer-score branch ---
    ans_feat = fused_mlp(ans_scores, params["ans"], ("leaky",))

    # --- fuse + predictor head (3 layers + sigmoid, fused) ---
    # Branch outputs stay 128-lane padded (pad lanes are exactly zero); the
    # head's first weight was scattered to match this padded concat layout.
    concat = jnp.concatenate([att_feats, im_feats, q_feats, ans_feat], axis=1)
    corr = fused_mlp(concat, params["head"], ("leaky", "leaky", "sigmoid"))

    return {
        "wrong_pred": corr[:, :1],
        "im_feature": im_feats_feature,
        "q_feats": q_feats[:, :hidden],
    }


# ------------------------------ pure-JAX reference ---------------------------

def _ref_mlp(x, layers, acts):
    kp = layers[0][0].shape[0]
    x = jnp.pad(x, ((0, 0), (0, kp - x.shape[1])))
    h = x.astype(jnp.bfloat16)
    y = None
    for (w, b), a in zip(layers, acts):
        y = jnp.dot(h, w, preferred_element_type=jnp.float32) + b
        if a == "leaky":
            y = jnp.where(y > 0, y, 0.1 * y)
        elif a == "sigmoid":
            y = jax.nn.sigmoid(y)
        h = y.astype(jnp.bfloat16)
    return y


def forward_ref(params, cfg, attention, im_feat, q_feat, ans_scores):
    hidden, conv_out = cfg["hidden"], cfg["conv_out"]
    att_feats = _ref_mlp(attention, params["att"], ("leaky",) * 3)
    b, cin, h, w = im_feat.shape
    x = jnp.transpose(im_feat, (0, 2, 3, 1)).reshape(b * h * w, cin)
    y = _ref_mlp(x, params["conv"], ("none",))[:, :conv_out]
    im_feats_feature = jnp.transpose(y.reshape(b, h, w, conv_out), (0, 3, 1, 2))
    im_feats = _ref_mlp(im_feats_feature.reshape(b, -1), params["iml"], ("leaky",) * 2)
    q_feats = _ref_mlp(q_feat, params["q"], ("leaky",) * 2)
    ans_feat = _ref_mlp(ans_scores, params["ans"], ("leaky",))
    concat = jnp.concatenate([att_feats, im_feats, q_feats, ans_feat], axis=1)
    corr = _ref_mlp(concat, params["head"], ("leaky", "leaky", "sigmoid"))
    return {"wrong_pred": corr[:, :1], "im_feature": im_feats_feature,
            "q_feats": q_feats[:, :hidden]}


# ------------------------------------------------------------------------------
if __name__ == "__main__":
    # Small stand-in shapes consistent with the module's forward signature:
    #   attention: (B, atten_dim), im_feat: (B, Cin, H, W) NCHW,
    #   q_feat: (B, q_feat_dim), ans_scores: (B, ans_dim)
    B = 2
    ATTEN_DIM = 256          # stand-in for 4*12*115*115
    HIDDEN = 32              # stand-in for 96
    Q_DIM = 32               # stand-in for 300
    IM_HW = (4, 4)           # stand-in for (7, 7)
    IM_CIN = 64              # stand-in for 2048
    CONV_OUT = 16            # stand-in for 1024
    ANS_DIM = 64             # stand-in for 3129

    key = jax.random.PRNGKey(0)
    kparam, ka, ki, kq, ks = jax.random.split(key, 5)

    params, cfg = init_params(kparam, ATTEN_DIM, HIDDEN, Q_DIM, IM_HW,
                              IM_CIN, CONV_OUT, ANS_DIM)

    attention = jax.random.normal(ka, (B, ATTEN_DIM), jnp.float32)
    im_feat = jax.random.normal(ki, (B, IM_CIN, IM_HW[0], IM_HW[1]), jnp.float32)
    q_feat = jax.random.normal(kq, (B, Q_DIM), jnp.float32)
    ans_scores = jax.random.normal(ks, (B, ANS_DIM), jnp.float32)

    out = forward(params, cfg, attention, im_feat, q_feat, ans_scores)
    jax.block_until_ready(out)

    ref = forward_ref(params, cfg, attention, im_feat, q_feat, ans_scores)
    assert out["wrong_pred"].shape == (B, 1)
    assert out["im_feature"].shape == (B, CONV_OUT, IM_HW[0], IM_HW[1])
    assert out["q_feats"].shape == (B, HIDDEN)
    for name in ("wrong_pred", "im_feature", "q_feats"):
        assert out[name].shape == ref[name].shape, name
        err = float(jnp.max(jnp.abs(out[name] - ref[name])))
        assert jnp.allclose(out[name], ref[name], atol=2e-2, rtol=2e-2), (name, err)

    print("KERNEL_OK")
</pallas_src>

<mosaic_0001>
module attributes {stable_mosaic.version = 11 : i64} {
  func.func @_fused_mlp_kernel(%arg0: i32, %arg1: i32, %arg2: memref<16x256xbf16, #tpu.memory_space<vmem>>, %arg3: memref<256x128xbf16, #tpu.memory_space<vmem>>, %arg4: memref<1x128xf32, #tpu.memory_space<vmem>>, %arg5: memref<128x128xbf16, #tpu.memory_space<vmem>>, %arg6: memref<1x128xf32, #tpu.memory_space<vmem>>, %arg7: memref<128x128xbf16, #tpu.memory_space<vmem>>, %arg8: memref<1x128xf32, #tpu.memory_space<vmem>>, %arg9: memref<16x128xf32, #tpu.memory_space<vmem>>) attributes {dimension_semantics = [#tpu.dimension_semantics<parallel>, #tpu.dimension_semantics<arbitrary>], iteration_bounds = array<i64: 1, 1>, scalar_prefetch = 0 : i64, scratch_operands = 0 : i64, tpu.core_type = #tpu.core_type<tc>, window_params = [{transform_indices = @transform_0, window_bounds = array<i64: 16, 256>}, {transform_indices = @transform_1, window_bounds = array<i64: 256, 128>}, {transform_indices = @transform_2, window_bounds = array<i64: 1, 128>}, {pipeline_mode = #tpu.pipeline_mode<synchronous>, transform_indices = @transform_3, window_bounds = array<i64: 128, 128>}, {pipeline_mode = #tpu.pipeline_mode<synchronous>, transform_indices = @transform_4, window_bounds = array<i64: 1, 128>}, {pipeline_mode = #tpu.pipeline_mode<synchronous>, transform_indices = @transform_5, window_bounds = array<i64: 128, 128>}, {pipeline_mode = #tpu.pipeline_mode<synchronous>, transform_indices = @transform_6, window_bounds = array<i64: 1, 128>}, {transform_indices = @transform_7, window_bounds = array<i64: 16, 128>}]} {
    %c0_i32 = arith.constant 0 : i32
    %0 = arith.cmpi eq, %arg1, %c0_i32 : i32
    %1 = arith.extui %0 : i1 to i32
    %c0_i32_0 = arith.constant 0 : i32
    %2 = arith.cmpi ne, %1, %c0_i32_0 : i32
    scf.if %2 {
      %cst_10 = arith.constant 0.000000e+00 : f32
      %12 = vector.broadcast %cst_10 : f32 to vector<16x128xf32>
      %c0_11 = arith.constant 0 : index
      %c0_12 = arith.constant 0 : index
      %13 = vector.load %arg9[%c0_11, %c0_12] : memref<16x128xf32, #tpu.memory_space<vmem>>, vector<16x128xf32>
      tpu.vector_store %arg9[%c0_11, %c0_12], %12 {strides = array<i32>} : memref<16x128xf32, #tpu.memory_space<vmem>>, vector<16x128xf32>,
    } else {
    }
    %c0 = arith.constant 0 : index
    %c0_1 = arith.constant 0 : index
    %3 = vector.load %arg9[%c0, %c0_1] : memref<16x128xf32, #tpu.memory_space<vmem>>, vector<16x128xf32>
    %c0_2 = arith.constant 0 : index
    %c0_3 = arith.constant 0 : index
    %4 = vector.load %arg2[%c0_2, %c0_3] : memref<16x256xbf16, #tpu.memory_space<vmem>>, vector<16x256xbf16>
    %c0_4 = arith.constant 0 : index
    %c0_5 = arith.constant 0 : index
    %5 = vector.load %arg3[%c0_4, %c0_5] : memref<256x128xbf16, #tpu.memory_space<vmem>>, vector<256x128xbf16>
    %cst = arith.constant dense<0.000000e+00> : vector<16x128xf32>
    %6 = tpu.matmul %4, %5, %cst {dimension_numbers = #tpu.dot_dimension_numbers<[1], [0], [0], [1], [0, 0, 1, 1], [], []>} : vector<16x256xbf16>, vector<256x128xbf16>, vector<16x128xf32> -> vector<16x128xf32>
    %7 = arith.addf %3, %6 : vector<16x128xf32>
    %c0_6 = arith.constant 0 : index
    %c0_7 = arith.constant 0 : index
    %8 = vector.load %arg9[%c0_6, %c0_7] : memref<16x128xf32, #tpu.memory_space<vmem>>, vector<16x128xf32>
    tpu.vector_store %arg9[%c0_6, %c0_7], %7 {strides = array<i32>} : memref<16x128xf32, #tpu.memory_space<vmem>>, vector<16x128xf32>,
    %c0_i32_8 = arith.constant 0 : i32
    %9 = arith.cmpi eq, %arg1, %c0_i32_8 : i32
    %10 = arith.extui %9 : i1 to i32
    %c0_i32_9 = arith.constant 0 : i32
    %11 = arith.cmpi ne, %10, %c0_i32_9 : i32
    scf.if %11 {
      %c0_10 = arith.constant 0 : index
      %c0_11 = arith.constant 0 : index
      %12 = vector.load %arg9[%c0_10, %c0_11] : memref<16x128xf32, #tpu.memory_space<vmem>>, vector<16x128xf32>
      %c0_12 = arith.constant 0 : index
      %c0_13 = arith.constant 0 : index
      %13 = vector.load %arg4[%c0_12, %c0_13] : memref<1x128xf32, #tpu.memory_space<vmem>>, vector<1x128xf32>
      %14 = vector.broadcast %13 : vector<1x128xf32> to vector<16x128xf32>
      %15 = arith.addf %12, %14 : vector<16x128xf32>
      %cst_14 = arith.constant 0.000000e+00 : f32
      %16 = vector.broadcast %cst_14 : f32 to vector<16x128xf32>
      %17 = arith.cmpf ogt, %15, %16 : vector<16x128xf32>
      %cst_15 = arith.constant 1.000000e-01 : f32
      %18 = vector.broadcast %cst_15 : f32 to vector<16x128xf32>
      %19 = arith.mulf %18, %15 : vector<16x128xf32>
      %20 = arith.select %17, %15, %19 : vector<16x128xi1>, vector<16x128xf32>
      %21 = arith.truncf %20 : vector<16x128xf32> to vector<16x128xbf16>
      %c0_16 = arith.constant 0 : index
      %c0_17 = arith.constant 0 : index
      %22 = vector.load %arg5[%c0_16, %c0_17] : memref<128x128xbf16, #tpu.memory_space<vmem>>, vector<128x128xbf16>
      %cst_18 = arith.constant dense<0.000000e+00> : vector<16x128xf32>
      %23 = tpu.matmul %21, %22, %cst_18 {dimension_numbers = #tpu.dot_dimension_numbers<[1], [0], [0], [1], [0, 0, 1, 1], [], []>} : vector<16x128xbf16>, vector<128x128xbf16>, vector<16x128xf32> -> vector<16x128xf32>
      %c0_19 = arith.constant 0 : index
      %c0_20 = arith.constant 0 : index
      %24 = vector.load %arg6[%c0_19, %c0_20] : memref<1x128xf32, #tpu.memory_space<vmem>>, vector<1x128xf32>
      %25 = vector.broadcast %24 : vector<1x128xf32> to vector<16x128xf32>
      %26 = arith.addf %23, %25 : vector<16x128xf32>
      %cst_21 = arith.constant 0.000000e+00 : f32
      %27 = vector.broadcast %cst_21 : f32 to vector<16x128xf32>
      %28 = arith.cmpf ogt, %26, %27 : vector<16x128xf32>
      %cst_22 = arith.constant 1.000000e-01 : f32
      %29 = vector.broadcast %cst_22 : f32 to vector<16x128xf32>
      %30 = arith.mulf %29, %26 : vector<16x128xf32>
      %31 = arith.select %28, %26, %30 : vector<16x128xi1>, vector<16x128xf32>
      %32 = arith.truncf %31 : vector<16x128xf32> to vector<16x128xbf16>
      %c0_23 = arith.constant 0 : index
      %c0_24 = arith.constant 0 : index
      %33 = vector.load %arg7[%c0_23, %c0_24] : memref<128x128xbf16, #tpu.memory_space<vmem>>, vector<128x128xbf16>
      %cst_25 = arith.constant dense<0.000000e+00> : vector<16x128xf32>
      %34 = tpu.matmul %32, %33, %cst_25 {dimension_numbers = #tpu.dot_dimension_numbers<[1], [0], [0], [1], [0, 0, 1, 1], [], []>} : vector<16x128xbf16>, vector<128x128xbf16>, vector<16x128xf32> -> vector<16x128xf32>
      %c0_26 = arith.constant 0 : index
      %c0_27 = arith.constant 0 : index
      %35 = vector.load %arg8[%c0_26, %c0_27] : memref<1x128xf32, #tpu.memory_space<vmem>>, vector<1x128xf32>
      %36 = vector.broadcast %35 : vector<1x128xf32> to vector<16x128xf32>
      %37 = arith.addf %34, %36 : vector<16x128xf32>
      %cst_28 = arith.constant 0.000000e+00 : f32
      %38 = vector.broadcast %cst_28 : f32 to vector<16x128xf32>
      %39 = arith.cmpf ogt, %37, %38 : vector<16x128xf32>
      %cst_29 = arith.constant 1.000000e-01 : f32
      %40 = vector.broadcast %cst_29 : f32 to vector<16x128xf32>
      %41 = arith.mulf %40, %37 : vector<16x128xf32>
      %42 = arith.select %39, %37, %41 : vector<16x128xi1>, vector<16x128xf32>
      %c0_30 = arith.constant 0 : index
      %c0_31 = arith.constant 0 : index
      %43 = vector.load %arg9[%c0_30, %c0_31] : memref<16x128xf32, #tpu.memory_space<vmem>>, vector<16x128xf32>
      tpu.vector_store %arg9[%c0_30, %c0_31], %42 {strides = array<i32>} : memref<16x128xf32, #tpu.memory_space<vmem>>, vector<16x128xf32>,
    } else {
    }
    return
  }
  func.func @transform_0(%arg0: i32, %arg1: i32) -> (i32, i32) {
    %c0_i32 = arith.constant 0 : i32
    %c0_i32_0 = arith.constant 0 : i32
    return %c0_i32, %arg1 : i32, i32
  }
  func.func @transform_1(%arg0: i32, %arg1: i32) -> (i32, i32) {
    %c0_i32 = arith.constant 0 : i32
    return %arg1, %arg0 : i32, i32
  }
  func.func @transform_2(%arg0: i32, %arg1: i32) -> (i32, i32) {
    %c0_i32 = arith.constant 0 : i32
    %c0_i32_0 = arith.constant 0 : i32
    return %c0_i32, %arg0 : i32, i32
  }
  func.func @transform_3(%arg0: i32, %arg1: i32) -> (i32, i32) {
    %c0_i32 = arith.constant 0 : i32
    %c0_i32_0 = arith.constant 0 : i32
    %c0_i32_1 = arith.constant 0 : i32
    return %c0_i32, %c0_i32_0 : i32, i32
  }
  func.func @transform_4(%arg0: i32, %arg1: i32) -> (i32, i32) {
    %c0_i32 = arith.constant 0 : i32
    %c0_i32_0 = arith.constant 0 : i32
    %c0_i32_1 = arith.constant 0 : i32
    return %c0_i32, %c0_i32_0 : i32, i32
  }
  func.func @transform_5(%arg0: i32, %arg1: i32) -> (i32, i32) {
    %c0_i32 = arith.constant 0 : i32
    %c0_i32_0 = arith.constant 0 : i32
    %c0_i32_1 = arith.constant 0 : i32
    return %c0_i32, %c0_i32_0 : i32, i32
  }
  func.func @transform_6(%arg0: i32, %arg1: i32) -> (i32, i32) {
    %c0_i32 = arith.constant 0 : i32
    %c0_i32_0 = arith.constant 0 : i32
    %c0_i32_1 = arith.constant 0 : i32
    return %c0_i32, %c0_i32_0 : i32, i32
  }
  func.func @transform_7(%arg0: i32, %arg1: i32) -> (i32, i32) {
    %c0_i32 = arith.constant 0 : i32
    %c0_i32_0 = arith.constant 0 : i32
    return %c0_i32, %arg0 : i32, i32
  }
}

</mosaic_0001>

<bundles_post_ra>
// kernel: tpu_custom_call.1
= control target key start
LH: loop header
LB: loop body
LE: loop exit
PB: predicated region body
PF: predicated region fallthrough
CT: control target
= control target key end

     0   :  { %12 = vsyncpa [#allocation3], 0  ;;  %s996_s0 = inlined_call_operand.hbm [shape: bf16[16,256], index: 0, kind: input, shape index: {}]   ;;  %s997_s1 = inlined_call_operand.hbm [shape: bf16[256,128], index: 1, kind: input, shape index: {}]   ;;  %s998_s2 = inlined_call_operand.vmem [shape: f32[1,128], index: 2, kind: input, shape index: {}]   ;;  %s999_s3 = inlined_call_operand.hbm [shape: bf16[128,128], index: 3, kind: input, shape index: {}]   ;;  %s1000_s4 = inlined_call_operand.vmem [shape: f32[1,128], index: 4, kind: input, shape index: {}]   ;;  %s1001_s5 = inlined_call_operand.hbm [shape: bf16[128,128], index: 5, kind: input, shape index: {}]   ;;  %s1002_s6 = inlined_call_operand.vmem [shape: f32[1,128], index: 6, kind: input, shape index: {}]   ;;  %s1003_s7 = inlined_call_operand.hbm [shape: f32[16,128], index: 7, kind: output, shape index: {}]  }
   0x1   :  { %13 = vsyncpa [#allocation6], 0 }
   0x2   :  { %14 = vsyncpa [#allocation9], 0 }
   0x3   :  { %15 = vsyncpa [#allocation4], 0  ;;  %s836_s24 = smov [#allocation5]   ;;  %s718_s28 = scalar_lea.hbm %s997_s1, 2048 }
   0x4   :  { %s33_s25 = sshll.u32 %s836_s24, 4  ;;  %p719_p0 = scmp.ne.s32.totalorder %s997_s1, %s718_s28  ;;  %s34_s25 = int_to_ptr.vmem [resolvable:$true] %s33_s25 }
   0x5   :  { %p722_p1 = scmp.lt.u32.totalorder %s718_s28, %s997_s1 }
   0x7   :  { %p724_p2 = pnand %p722_p1, %p719_p0 }
   0x9   :  { %727 = shalt.err (!%p724_p2)
}
   0xa   :  { %s728_s10 = scalar_lea.vmem %s34_s25, 2048  ;;  %p733_p4 = scmp.lt.s32.totalorder %s34_s25, %s34_s25 }
   0xb   :  { %p729_p3 = scmp.ne.s32.totalorder %s34_s25, %s728_s10  ;;  %p734_p5 = scmp.lt.s32.totalorder %s728_s10, %s728_s10 }
   0xd   :  { %p735_p6 = por %p734_p5, %p733_p4 }
   0xf   :  { %p736_p7 = pnand %p735_p6, %p729_p3 }
  0x11   :  { %739 = shalt.err (!%p736_p7)
}
  0x12   :  { %s837_s11 = smov 64   ;;  %s838_s12 = smov 4  }
  0x13   :  { %39 = dma.hbm_to_vmem [thread:$0]  %s997_s1, 2048, %s34_s25, [#allocation6], %s837_s11, %s837_s11, %s838_s12  }
  0x14   :  { %s839_s15 = smov [#allocation2]   ;;  %s740_s19 = scalar_lea.hbm %s996_s0, 256 }
  0x15   :  { %s21_s16 = sshll.u32 %s839_s15, 4  ;;  %p741_p8 = scmp.ne.s32.totalorder %s996_s0, %s740_s19  ;;  %s22_s16 = int_to_ptr.vmem [resolvable:$true] %s21_s16 }
  0x16   :  { %p744_p9 = scmp.lt.u32.totalorder %s740_s19, %s996_s0 }
  0x18   :  { %p746_p10 = pnand %p744_p9, %p741_p8 }
  0x1a   :  { %749 = shalt.err (!%p746_p10)
}
  0x1b   :  { %s750_s24 = scalar_lea.vmem %s22_s16, 256  ;;  %p755_p12 = scmp.lt.s32.totalorder %s22_s16, %s22_s16 }
  0x1c   :  { %p751_p11 = scmp.ne.s32.totalorder %s22_s16, %s750_s24  ;;  %p756_p13 = scmp.lt.s32.totalorder %s750_s24, %s750_s24 }
  0x1e   :  { %p757_p0 = por %p756_p13, %p755_p12 }
  0x20   :  { %p758_p1 = pnand %p757_p0, %p751_p11 }
  0x22   :  { %761 = shalt.err (!%p758_p1)
}
  0x23   :  { %s840_s1 = smov 128   ;;  %s841_s25 = smov 8  }
  0x24   :  { %27 = dma.hbm_to_vmem [thread:$0]  %s996_s0, 256, %s22_s16, [#allocation3], %s840_s1, %s840_s1, %s841_s25  }
  0x25   :  { %s842_s28 = smov [#allocation7]   ;;  %s843_s30 = smov [#allocation8]  }
  0x26   :  { %s47_s29 = sshll.u32 %s842_s28, 4  ;;  %s61_s8 = sshll.u32 %s843_s30, 4  ;;  %s48_s29 = int_to_ptr.vmem [resolvable:$true] %s47_s29  ;;  %s917_s8 = int_to_ptr.vmem [resolvable:$true] %s61_s8 }
  0x27   :  { %s762_s13 = scalar_lea.hbm %s999_s3, 1024 }
  0x28   :  { %p763_p2 = scmp.ne.s32.totalorder %s999_s3, %s762_s13  ;;  %p766_p3 = scmp.lt.u32.totalorder %s762_s13, %s999_s3 }
  0x2a   :  { %p768_p4 = pnand %p766_p3, %p763_p2 }
  0x2c   :  { %771 = shalt.err (!%p768_p4)
}
  0x2d   :  { %s772_s0 = scalar_lea.vmem %s48_s29, 1024  ;;  %p777_p6 = scmp.lt.s32.totalorder %s48_s29, %s48_s29 }
  0x2e   :  { %p773_p5 = scmp.ne.s32.totalorder %s48_s29, %s772_s0  ;;  %p778_p7 = scmp.lt.s32.totalorder %s772_s0, %s772_s0 }
  0x30   :  { %p779_p8 = por %p778_p7, %p777_p6 }
  0x32   :  { %p780_p9 = pnand %p779_p8, %p773_p5 }
  0x34   :  { %783 = shalt.err (!%p780_p9)
}
  0x35   :  { %53 = dma.hbm_to_vmem [thread:$0]  %s999_s3, 1024, %s48_s29, [#allocation6], %s837_s11, %s837_s11, %s838_s12  }
  0x36   :  { %s784_s22 = scalar_lea.hbm %s1001_s5, 1024 }
  0x37   :  { %p785_p10 = scmp.ne.s32.totalorder %s1001_s5, %s784_s22  ;;  %p788_p11 = scmp.lt.u32.totalorder %s784_s22, %s1001_s5 }
  0x39   :  { %p790_p12 = pnand %p788_p11, %p785_p10 }
  0x3b   :  { %793 = shalt.err (!%p790_p12)
}
  0x3c   :  { %s794_s28 = scalar_lea.vmem %s917_s8, 1024  ;;  %p799_p0 = scmp.lt.s32.totalorder %s917_s8, %s917_s8 }
  0x3d   :  { %p795_p13 = scmp.ne.s32.totalorder %s917_s8, %s794_s28  ;;  %p800_p1 = scmp.lt.s32.totalorder %s794_s28, %s794_s28 }
  0x3f   :  { %p801_p2 = por %p800_p1, %p799_p0 }
  0x41   :  { %p802_p3 = pnand %p801_p2, %p795_p13 }
  0x43   :  { %805 = shalt.err (!%p802_p3)
}
  0x44   :  { %67 = dma.hbm_to_vmem [thread:$0]  %s1001_s5, 1024, %s917_s8, [#allocation9], %s837_s11, %s837_s11, %s838_s12  }
  0x45   :  { %828 = dma.done.wait [#allocation3], 256  }
  0x46   :  { %829 = vsyncadd [#allocation3], 4294967040 }
  0x47   :  { %830 = dma.done.wait [#allocation6], 3072  }
  0x48   :  { %831 = vsyncadd [#allocation6], 4294964224 }
  0x49   :  { %832 = dma.done.wait [#allocation9], 1024  }
  0x4a   :  { %833 = vsyncadd [#allocation9], 4294966272  ;;  %v844_v0 = vmov 0.0   ;;  %v683_v1 = vld [vmem:[#allocation5 + $0x40] sm:$0xff]   ;;  %v685_v3 = vld [vmem:[#allocation5 + $0x48] sm:$0xff]   ;;  %vm845_vm0 = vmmov 0  }
  0x4b   :  { %632 = vmatprep.subr.bf16.mxu1 %v844_v0  ;;  %v684_v2 = vld [vmem:[#allocation5] sm:$0xff]   ;;  %592 = vmatprep.subr.bf16.mxu0 %v683_v1  ;;  %v686_v4 = vld [vmem:[#allocation5 + $0x8] sm:$0xff]   ;;  %v687_v5 = vld [vmem:[#allocation5 + $0x50] sm:$0xff]  }
  0x4c   :  { %593 = vmatpush3.bf16.msra.mxu0 %v684_v2  ;;  %v688_v6 = vld [vmem:[#allocation5 + $0x10] sm:$0xff]   ;;  %v689_v7 = vld [vmem:[#allocation5 + $0x58] sm:$0xff]   ;;  %v691_v9 = vld [vmem:[#allocation5 + $0x60] sm:$0xff]   ;;  %648 = vmatprep.mubr.msk.bf16.mxu1 %vm845_vm0, %v844_v0 }
  0x4d   :  { %594 = vmatprep.subr.bf16.mxu0 %v685_v3  ;;  %v690_v8 = vld [vmem:[#allocation5 + $0x18] sm:$0xff]   ;;  %v692_v10 = vld [vmem:[#allocation5 + $0x20] sm:$0xff]   ;;  %v693_v11 = vld [vmem:[#allocation5 + $0x68] sm:$0xff]  }
  0x4e   :  { %v694_v12 = vld [vmem:[#allocation5 + $0x28] sm:$0xff]   ;;  %v701_v13 = vld [vmem:[#allocation2 + $0x4] ss:$8 sps:$4 sm:$0xff]   ;;  %v702_v15 = vld [vmem:[#allocation7] sm:$0xff]  }
  0x4f   :  { %v695_v14 = vld [vmem:[#allocation5 + $0x70] sm:$0xff]   ;;  %263 = vmatprep.mubr.bf16.mxu0 %v701_v13  ;;  %v703_v16 = vld [vmem:[#allocation7 + $0x8] sm:$0xff]   ;;  %633 = vmatpush3.bf16.msra.mxu1 %v702_v15  ;;  %v697_v18 = vld [vmem:[#allocation5 + $0x78] sm:$0xff]  }
  0x50   :  { %595 = vmatpush3.bf16.msra.mxu0 %v686_v4  ;;  %v696_v17 = vld [vmem:[#allocation5 + $0x30] sm:$0xff]   ;;  %634 = vmatprep.subr.bf16.mxu1 %v844_v0  ;;  %v698_v19 = vld [vmem:[#allocation5 + $0x38] sm:$0xff]   ;;  %v706_v23 = vld [vmem:[#allocation7 + $0x20] sm:$0xff]  }
  0x51   :  { %596 = vmatprep.subr.bf16.mxu0 %v687_v5  ;;  %v699_v20 = vld [vmem:[#allocation2] ss:$8 sps:$4 sm:$0xff]   ;;  %v707_v24 = vld [vmem:[#allocation7 + $0x28] sm:$0xff]   ;;  %v710_v27 = vld [vmem:[#allocation8] sm:$0xff]  }
  0x52   :  { %v704_v21 = vld [vmem:[#allocation7 + $0x10] sm:$0xff]   ;;  %v705_v22 = vld [vmem:[#allocation7 + $0x18] sm:$0xff]   ;;  %v711_v28 = vld [vmem:[#allocation8 + $0x8] sm:$0xff]  }
  0x53   :  { %635 = vmatpush3.bf16.msra.mxu1 %v703_v16  ;;  %v708_v25 = vld [vmem:[#allocation7 + $0x30] sm:$0xff]   ;;  %v709_v26 = vld [vmem:[#allocation7 + $0x38] sm:$0xff]   ;;  %v714_v31 = vld [vmem:[#allocation8 + $0x20] sm:$0xff]  }
  0x54   :  { %597 = vmatpush3.bf16.msra.mxu0 %v688_v6  ;;  %636 = vmatprep.subr.bf16.mxu1 %v844_v0  ;;  %v712_v29 = vld [vmem:[#allocation8 + $0x10] sm:$0xff]   ;;  %v713_v30 = vld [vmem:[#allocation8 + $0x18] sm:$0xff]   ;;  %v715_v32 = vld [vmem:[#allocation8 + $0x28] sm:$0xff]  }
  0x55   :  { %598 = vmatprep.subr.bf16.mxu0 %v689_v7  ;;  %v573_v38 = vld [vmem:[%s998_s2] ss:$0 sm:$0xff]  ;;  %v717_v48 = vld [vmem:[#allocation8 + $0x38] sm:$0xff]  }
  0x56   :  { %v716_v47 = vld [vmem:[#allocation8 + $0x30] sm:$0xff]  }
  0x57   :  { %637 = vmatpush3.bf16.msra.mxu1 %v704_v21  ;;  %v574_v49 = vld [vmem:[%s1000_s4] ss:$0 sm:$0xff]  ;;  %s846_s4 = smov [#allocation10]  }
  0x58   :  { %599 = vmatpush3.bf16.msra.mxu0 %v690_v8  ;;  %638 = vmatprep.subr.bf16.mxu1 %v844_v0  ;;  %v583_v61 = vld [vmem:[%s1002_s6] ss:$0 sm:$0xff]  ;;  %s541_s9 = sshll.u32 %s846_s4, 4  ;;  %s542_s9 = int_to_ptr.vmem [resolvable:$true] %s541_s9 }
  0x59   :  { %600 = vmatprep.subr.bf16.mxu0 %v691_v9  ;;  %s806_s10 = scalar_lea.vmem %s542_s9, 256  ;;  %p811_p5 = scmp.lt.s32.totalorder %s542_s9, %s542_s9 }
  0x5a   :  { %p807_p4 = scmp.ne.s32.totalorder %s542_s9, %s806_s10  ;;  %p812_p6 = scmp.lt.s32.totalorder %s806_s10, %s806_s10 }
  0x5b   :  { %639 = vmatpush3.bf16.msra.mxu1 %v705_v22 }
  0x5c   :  { %601 = vmatpush3.bf16.msra.mxu0 %v692_v10  ;;  %640 = vmatprep.subr.bf16.mxu1 %v844_v0  ;;  %p813_p7 = por %p812_p6, %p811_p5 }
  0x5d   :  { %602 = vmatprep.subr.bf16.mxu0 %v693_v11 }
  0x5e   :  { %p814_p8 = pnand %p813_p7, %p807_p4 }
  0x5f   :  { %641 = vmatpush3.bf16.msra.mxu1 %v706_v23 }
  0x60   :  { %603 = vmatpush3.bf16.msra.mxu0 %v694_v12  ;;  %642 = vmatprep.subr.bf16.mxu1 %v844_v0 }
  0x61   :  { %604 = vmatprep.subr.bf16.mxu0 %v695_v14 }
  0x63   :  { %643 = vmatpush3.bf16.msra.mxu1 %v707_v24 }
  0x64   :  { %605 = vmatpush3.bf16.msra.mxu0 %v696_v17  ;;  %644 = vmatprep.subr.bf16.mxu1 %v844_v0 }
  0x65   :  { %606 = vmatprep.subr.bf16.mxu0 %v697_v18 }
  0x67   :  { %645 = vmatpush3.bf16.msra.mxu1 %v708_v25 }
  0x68   :  { %607 = vmatpush3.bf16.msra.mxu0 %v698_v19  ;;  %646 = vmatprep.subr.bf16.mxu1 %v844_v0 }
  0x69   :  { %652 = vmatprep.subr.bf16.mxu0 %v844_v0 }
  0x6b   :  { %264 = vmatmul.mubr.bf16.vlgmr.msra.gmra.mrb[0].mxu0 %v699_v20  ;;  %647 = vmatpush3.bf16.msra.mxu1 %v709_v26 }
  0x6c   :  { %668 = vmatprep.mubr.msk.bf16.mxu0 %vm845_vm0, %v844_v0  ;;  %653 = vmatpush3.bf16.msra.mxu0 %v710_v27 }
  0x6d   :  { %654 = vmatprep.subr.bf16.mxu0 %v844_v0 }
  0x70   :  { %655 = vmatpush3.bf16.msra.mxu0 %v711_v28 }
  0x71   :  { %656 = vmatprep.subr.bf16.mxu0 %v844_v0 }
  0x74   :  { %657 = vmatpush3.bf16.msra.mxu0 %v712_v29 }
  0x75   :  { %658 = vmatprep.subr.bf16.mxu0 %v844_v0 }
  0x78   :  { %659 = vmatpush3.bf16.msra.mxu0 %v713_v30 }
  0x79   :  { %660 = vmatprep.subr.bf16.mxu0 %v844_v0 }
  0x7c   :  { %661 = vmatpush3.bf16.msra.mxu0 %v714_v31 }
  0x7d   :  { %662 = vmatprep.subr.bf16.mxu0 %v844_v0 }
  0x80   :  { %663 = vmatpush3.bf16.msra.mxu0 %v715_v32 }
  0x81   :  { %664 = vmatprep.subr.bf16.mxu0 %v844_v0 }
  0x84   :  { %665 = vmatpush3.bf16.msra.mxu0 %v716_v47 }
  0x85   :  { %666 = vmatprep.subr.bf16.mxu0 %v844_v0 }
  0x88   :  { %667 = vmatpush3.bf16.msra.mxu0 %v717_v48 }
 0x13e   :  { %v608_v33 = vpop.f32.mrb[0].mxu0 }
 0x13f   :  { %v609_v34 = vpop.f32.mrb[1].mxu0 }
 0x140   :  { %v610_v35 = vadd.f32 %v609_v34, %v608_v33  ;;  %v611_v36 = vpop.f32.mrb[2].mxu0 }
 0x141   :  { %v612_v37 = vpop.f32.mrb[3].mxu0 }
 0x142   :  { %v613_v39 = vadd.f32 %v612_v37, %v611_v36  ;;  %v288_v40 = vadd.f32 %v610_v35, %v573_v38 }
 0x144   :  { %v289_v41 = vadd.f32 %v613_v39, %v573_v38  ;;  %v292_v42 = vmul.f32 0.1, %v288_v40  ;;  %vm290_vm1 = vcmp.gt.f32.partialorder %v288_v40, 0.0 }
 0x146   :  { %vm291_vm2 = vcmp.gt.f32.partialorder %v289_v41, 0.0  ;;  %v293_v43 = vmul.f32 0.1, %v289_v41  ;;  %v294_v44 = vsel %vm290_vm1, %v288_v40, %v292_v42 }
 0x148   :  { %v295_v45 = vsel %vm291_vm2, %v289_v41, %v293_v43 }
 0x149   :  { %v296_v46 = vpack.c.bf16 %v295_v45, %v294_v44 }
 0x14b   :  { %649 = vmatmul.mubr.bf16.vlgmr.msra.gmra.mrb[0].mxu1 %v296_v46 }
 0x21e   :  { %v402_v50 = vpop.f32.mrb[0].mxu1 }
 0x21f   :  { %v403_v51 = vadd.f32 %v574_v49, %v402_v50  ;;  %v650_v52 = vpop.f32.mrb[1].mxu1 }
 0x220   :  { %v405_v53 = vpop.f32.mrb[2].mxu1 }
 0x221   :  { %v411_v54 = vmul.f32 0.1, %v403_v51  ;;  %v406_v55 = vadd.f32 %v574_v49, %v405_v53  ;;  %v651_v56 = vpop.f32.mrb[3].mxu1  ;;  %vm409_vm3 = vcmp.gt.f32.partialorder %v403_v51, 0.0 }
 0x223   :  { %vm410_vm4 = vcmp.gt.f32.partialorder %v406_v55, 0.0  ;;  %v412_v57 = vmul.f32 0.1, %v406_v55  ;;  %v413_v58 = vsel %vm409_vm3, %v403_v51, %v411_v54 }
 0x225   :  { %v414_v59 = vsel %vm410_vm4, %v406_v55, %v412_v57 }
 0x226   :  { %v415_v60 = vpack.c.bf16 %v414_v59, %v413_v58 }
 0x228   :  { %669 = vmatmul.mubr.bf16.vlgmr.msra.gmra.mrb[4].mxu0 %v415_v60 }
 0x2fb   :  { %v521_v62 = vpop.f32.mrb[4].mxu0 }
 0x2fc   :  { %v522_v63 = vadd.f32 %v583_v61, %v521_v62  ;;  %v670_v0 = vpop.f32.mrb[5].mxu0 }
 0x2fd   :  { %v524_v1 = vpop.f32.mrb[6].mxu0 }
 0x2fe   :  { %vm528_vm5 = vcmp.gt.f32.partialorder %v522_v63, 0.0  ;;  %v530_v2 = vmul.f32 0.1, %v522_v63  ;;  %v525_v3 = vadd.f32 %v583_v61, %v524_v1  ;;  %v671_v4 = vpop.f32.mrb[7].mxu0 }
 0x300   :  { %v532_v5 = vsel %vm528_vm5, %v522_v63, %v530_v2  ;;  %vm529_vm6 = vcmp.gt.f32.partialorder %v525_v3, 0.0  ;;  %v531_v6 = vmul.f32 0.1, %v525_v3 }
 0x301   :  { %534 = vst [vmem:[#allocation10] sm:$0xff] %v532_v5 }
 0x302   :  { %v533_v7 = vsel %vm529_vm6, %v525_v3, %v531_v6 }
 0x303   :  { %535 = vst [vmem:[#allocation10 + $0x8] sm:$0xff] %v533_v7 }
 0x304   :  { %817 = shalt.err (!%p814_p8)
}
 0x305   :  { %s818_s14 = scalar_lea.hbm %s1003_s7, 256 }
 0x306   :  { %p819_p9 = scmp.ne.s32.totalorder %s1003_s7, %s818_s14  ;;  %p822_p10 = scmp.lt.u32.totalorder %s818_s14, %s1003_s7 }
 0x308   :  { %p824_p11 = pnand %p822_p10, %p819_p9 }
 0x30a   :  { %827 = shalt.err (!%p824_p11)
}
 0x30b   :  { %547 = dma.vmem_to_hbm [thread:$0]  %s542_s9, 256, %s1003_s7, [#allocation4], %s840_s1, %s840_s1, %s841_s25  }
 0x30c   :  { %834 = dma.done.wait [#allocation4], 256  }
 0x30d   :  { %835 = vsyncadd [#allocation4], 4294967040 }
 0x30e   :  { %551 = vsyncpa [#allocation3], 1 }
 0x30f   :  { %552 = vsyncpa [#allocation6], 1 }
 0x310   :  { %553 = vsyncpa [#allocation9], 1 }
 0x311   :  { %554 = vsyncpa [#allocation4], 1 }

</bundles_post_ra>
